<compile_context>
chip_gen: v7x
topology: tpu7x:2x2x1
jax: 0.10.0
libtpu: 0.0.40
codegen_flags: <defaults>
</compile_context>

<pallas_src>
import jax
import jax.numpy as jnp
from jax.experimental import pallas as pl
from jax.experimental.pallas import tpu as pltpu


def _cross_stitch_kernel(w_ref, x_ref, out_ref):
    """One (row_tile, lane_tile) slab: produce all T task outputs from all T inputs.

    w_ref:   (T, T, row_tile, 1) f32   per-row weights (row = n*C + c)
    x_ref:   (T, row_tile, lane_tile)  input features for every task
    out_ref: (T, row_tile, lane_tile)  cross-stitched output for every task
    """
    num_tasks = x_ref.shape[0]
    w = w_ref[...]                                    # tiny block, load once
    for i in range(num_tasks):                        # static unroll: output tasks
        acc = w[i, 0] * x_ref[0].astype(jnp.float32)  # (row_tile, 1) * (row_tile, lane_tile)
        for j in range(1, num_tasks):                 # static unroll: source tasks
            acc = acc + w[i, j] * x_ref[j].astype(jnp.float32)
        out_ref[i] = acc.astype(out_ref.dtype)


def _choose_tile(size, candidates, align):
    """Largest candidate tile (multiple of `align`) dividing `size`, else full extent."""
    if size % align != 0:
        return size  # block dim == full array dim is always legal
    for c in candidates:
        if size % c == 0:
            return c
    return size


def cross_stitch_pallas(x_all, params):
    """x_all: [T, N, C, H, W]; params: [T, T, C] -> [T, N, C, H, W]."""
    T, N, C, H, W = x_all.shape
    assert params.shape == (T, T, C)
    rows, lanes = N * C, H * W

    # Lane-dense view: rows (= N*C) on sublanes, spatial on lanes (contiguous -> free reshape).
    x_flat = x_all.reshape(T, rows, lanes)

    # Expand per-channel weights to per-row weights once (a few KB of work).
    w_rows = jnp.broadcast_to(
        params.astype(jnp.float32)[:, :, None, :], (T, T, N, C)
    ).reshape(T, T, rows, 1)

    # Tile sizes: sublane tile multiple of 8, lane tile 512-1024 wide when possible.
    row_tile = _choose_tile(rows, (128, 64, 32, 24, 16, 8), 8)
    lane_tile = _choose_tile(lanes, (1024, 896, 768, 640, 512, 384, 256, 128), 128)

    grid = (pl.cdiv(rows, row_tile), pl.cdiv(lanes, lane_tile))

    out_flat = pl.pallas_call(
        _cross_stitch_kernel,
        out_shape=jax.ShapeDtypeStruct((T, rows, lanes), x_all.dtype),
        grid_spec=pltpu.PrefetchScalarGridSpec(
            num_scalar_prefetch=0,
            grid=grid,
            in_specs=[
                # Per-row cross-stitch weights for this row block (tiny).
                pl.BlockSpec((T, T, row_tile, 1), lambda r, l: (0, 0, r, 0)),
                # Features of all T tasks for this (rows, lanes) slab.
                pl.BlockSpec((T, row_tile, lane_tile), lambda r, l: (0, r, l)),
            ],
            # All T mixed outputs for the same slab (lane-dense stores).
            out_specs=pl.BlockSpec((T, row_tile, lane_tile), lambda r, l: (0, r, l)),
        ),
        compiler_params=pltpu.CompilerParams(
            dimension_semantics=("parallel", "parallel"),
        ),
    )(w_rows, x_flat)

    return out_flat.reshape(T, N, C, H, W)


def cross_stitch_unit(task_features, params, task_names):
    """task_features: dict task -> [N, C, H, W]; params: [T, T, C].

    Returns dict task -> [N, C, H, W], matching CrossStitchUnit.forward.
    Note: for production use, keep features stacked as [T, N, C, H, W] end-to-end
    (cross_stitch_pallas) to avoid the extra HBM pass from stack/unstack here.
    """
    xs = [task_features[t] for t in task_names]
    x_all = jnp.stack(xs, axis=0)
    out_all = cross_stitch_pallas(x_all, params)
    return {t: out_all[i] for i, t in enumerate(task_names)}


def make_cross_stitch_params(num_tasks, num_channels, alpha, beta, dtype=jnp.float32):
    """Deterministic init: alpha on the diagonal (same task), beta off-diagonal."""
    eye = jnp.eye(num_tasks, dtype=dtype)[:, :, None]           # [T, T, 1]
    p = alpha * eye + beta * (1.0 - eye)                        # [T, T, 1]
    return jnp.broadcast_to(p, (num_tasks, num_tasks, num_channels)).astype(dtype)


if __name__ == "__main__":
    # Small shapes consistent with the module: 2 tasks, batch=2, channels=4, 16x16 spatial.
    tasks = ("seg", "depth")
    N, C, H, W = 2, 4, 16, 16
    alpha, beta = 0.9, 0.1

    key = jax.random.PRNGKey(0)
    k1, k2 = jax.random.split(key)
    task_features = {
        "seg": jax.random.normal(k1, (N, C, H, W), dtype=jnp.float32),
        "depth": jax.random.normal(k2, (N, C, H, W), dtype=jnp.float32),
    }

    params = make_cross_stitch_params(len(tasks), C, alpha, beta)

    out = cross_stitch_unit(task_features, params, tasks)
    out = jax.tree_util.tree_map(jax.block_until_ready, out)

    # Reference check (plain JAX) to make sure semantics match the PyTorch module.
    for i, t_i in enumerate(tasks):
        ref = jnp.zeros((N, C, H, W), dtype=jnp.float32)
        for j, t_j in enumerate(tasks):
            ref = ref + params[i, j][None, :, None, None] * task_features[t_j]
        assert jnp.allclose(out[t_i], ref, atol=1e-5, rtol=1e-5), f"mismatch for task {t_i}"

    print("KERNEL_OK")
</pallas_src>

<mosaic_0001>
module attributes {stable_mosaic.version = 11 : i64} {
  func.func @_cross_stitch_kernel(%arg0: i32, %arg1: i32, %arg2: memref<2x2x8x1xf32, #tpu.memory_space<vmem>>, %arg3: memref<2x8x256xf32, #tpu.memory_space<vmem>>, %arg4: memref<2x8x256xf32, #tpu.memory_space<vmem>>) attributes {dimension_semantics = [#tpu.dimension_semantics<parallel>, #tpu.dimension_semantics<parallel>], iteration_bounds = array<i64: 1, 1>, scalar_prefetch = 0 : i64, scratch_operands = 0 : i64, tpu.core_type = #tpu.core_type<tc>, window_params = [{transform_indices = @transform_0, window_bounds = array<i64: 2, 2, 8, 1>}, {transform_indices = @transform_1, window_bounds = array<i64: 2, 8, 256>}, {transform_indices = @transform_2, window_bounds = array<i64: 2, 8, 256>}]} {
    %c0 = arith.constant 0 : index
    %c0_0 = arith.constant 0 : index
    %c0_1 = arith.constant 0 : index
    %c0_2 = arith.constant 0 : index
    %0 = vector.load %arg2[%c0, %c0_0, %c0_1, %c0_2] : memref<2x2x8x1xf32, #tpu.memory_space<vmem>>, vector<2x2x8x1xf32>
    %1 = vector.extract_strided_slice %0 {offsets = [0, 0, 0, 0], sizes = [1, 1, 8, 1], strides = [1, 1, 1, 1]} : vector<2x2x8x1xf32> to vector<1x1x8x1xf32>
    %2 = vector.shape_cast %1 : vector<1x1x8x1xf32> to vector<8x1xf32>
    %c0_3 = arith.constant 0 : index
    %c0_4 = arith.constant 0 : index
    %c0_5 = arith.constant 0 : index
    %3 = vector.load %arg3[%c0_3, %c0_4, %c0_5] : memref<2x8x256xf32, #tpu.memory_space<vmem>>, vector<1x8x256xf32>
    %4 = vector.shape_cast %3 : vector<1x8x256xf32> to vector<8x256xf32>
    %5 = vector.broadcast %2 : vector<8x1xf32> to vector<8x256xf32>
    %6 = arith.mulf %5, %4 : vector<8x256xf32>
    %7 = vector.extract_strided_slice %0 {offsets = [0, 1, 0, 0], sizes = [1, 1, 8, 1], strides = [1, 1, 1, 1]} : vector<2x2x8x1xf32> to vector<1x1x8x1xf32>
    %8 = vector.shape_cast %7 : vector<1x1x8x1xf32> to vector<8x1xf32>
    %c1 = arith.constant 1 : index
    %c0_6 = arith.constant 0 : index
    %c0_7 = arith.constant 0 : index
    %9 = vector.load %arg3[%c1, %c0_6, %c0_7] : memref<2x8x256xf32, #tpu.memory_space<vmem>>, vector<1x8x256xf32>
    %10 = vector.shape_cast %9 : vector<1x8x256xf32> to vector<8x256xf32>
    %11 = vector.broadcast %8 : vector<8x1xf32> to vector<8x256xf32>
    %12 = arith.mulf %11, %10 : vector<8x256xf32>
    %13 = arith.addf %6, %12 : vector<8x256xf32>
    %c0_8 = arith.constant 0 : index
    %c0_9 = arith.constant 0 : index
    %c0_10 = arith.constant 0 : index
    %14 = vector.load %arg4[%c0_8, %c0_9, %c0_10] : memref<2x8x256xf32, #tpu.memory_space<vmem>>, vector<1x8x256xf32>
    %15 = vector.shape_cast %14 : vector<1x8x256xf32> to vector<8x256xf32>
    %16 = vector.shape_cast %13 : vector<8x256xf32> to vector<1x8x256xf32>
    tpu.vector_store %arg4[%c0_8, %c0_9, %c0_10], %16 {strides = array<i32>} : memref<2x8x256xf32, #tpu.memory_space<vmem>>, vector<1x8x256xf32>,
    %17 = vector.extract_strided_slice %0 {offsets = [1, 0, 0, 0], sizes = [1, 1, 8, 1], strides = [1, 1, 1, 1]} : vector<2x2x8x1xf32> to vector<1x1x8x1xf32>
    %18 = vector.shape_cast %17 : vector<1x1x8x1xf32> to vector<8x1xf32>
    %c0_11 = arith.constant 0 : index
    %c0_12 = arith.constant 0 : index
    %c0_13 = arith.constant 0 : index
    %19 = vector.load %arg3[%c0_11, %c0_12, %c0_13] : memref<2x8x256xf32, #tpu.memory_space<vmem>>, vector<1x8x256xf32>
    %20 = vector.shape_cast %19 : vector<1x8x256xf32> to vector<8x256xf32>
    %21 = vector.broadcast %18 : vector<8x1xf32> to vector<8x256xf32>
    %22 = arith.mulf %21, %20 : vector<8x256xf32>
    %23 = vector.extract_strided_slice %0 {offsets = [1, 1, 0, 0], sizes = [1, 1, 8, 1], strides = [1, 1, 1, 1]} : vector<2x2x8x1xf32> to vector<1x1x8x1xf32>
    %24 = vector.shape_cast %23 : vector<1x1x8x1xf32> to vector<8x1xf32>
    %c1_14 = arith.constant 1 : index
    %c0_15 = arith.constant 0 : index
    %c0_16 = arith.constant 0 : index
    %25 = vector.load %arg3[%c1_14, %c0_15, %c0_16] : memref<2x8x256xf32, #tpu.memory_space<vmem>>, vector<1x8x256xf32>
    %26 = vector.shape_cast %25 : vector<1x8x256xf32> to vector<8x256xf32>
    %27 = vector.broadcast %24 : vector<8x1xf32> to vector<8x256xf32>
    %28 = arith.mulf %27, %26 : vector<8x256xf32>
    %29 = arith.addf %22, %28 : vector<8x256xf32>
    %c1_17 = arith.constant 1 : index
    %c0_18 = arith.constant 0 : index
    %c0_19 = arith.constant 0 : index
    %30 = vector.load %arg4[%c1_17, %c0_18, %c0_19] : memref<2x8x256xf32, #tpu.memory_space<vmem>>, vector<1x8x256xf32>
    %31 = vector.shape_cast %30 : vector<1x8x256xf32> to vector<8x256xf32>
    %32 = vector.shape_cast %29 : vector<8x256xf32> to vector<1x8x256xf32>
    tpu.vector_store %arg4[%c1_17, %c0_18, %c0_19], %32 {strides = array<i32>} : memref<2x8x256xf32, #tpu.memory_space<vmem>>, vector<1x8x256xf32>,
    return
  }
  func.func @transform_0(%arg0: i32, %arg1: i32) -> (i32, i32, i32, i32) {
    %c0_i32 = arith.constant 0 : i32
    %c0_i32_0 = arith.constant 0 : i32
    %c0_i32_1 = arith.constant 0 : i32
    %c0_i32_2 = arith.constant 0 : i32
    return %c0_i32, %c0_i32_0, %arg0, %c0_i32_1 : i32, i32, i32, i32
  }
  func.func @transform_1(%arg0: i32, %arg1: i32) -> (i32, i32, i32) {
    %c0_i32 = arith.constant 0 : i32
    %c0_i32_0 = arith.constant 0 : i32
    return %c0_i32, %arg0, %arg1 : i32, i32, i32
  }
  func.func @transform_2(%arg0: i32, %arg1: i32) -> (i32, i32, i32) {
    %c0_i32 = arith.constant 0 : i32
    %c0_i32_0 = arith.constant 0 : i32
    return %c0_i32, %arg0, %arg1 : i32, i32, i32
  }
}

</mosaic_0001>

<bundles_post_ra>
// kernel: tpu_custom_call.1
= control target key start
LH: loop header
LB: loop body
LE: loop exit
PB: predicated region body
PF: predicated region fallthrough
CT: control target
= control target key end

     0   :  { %v112_v2 = vmov 0   ;;  %s167_s0 = inlined_call_operand.vmem [shape: f32[2,2,8,1], index: 0, kind: input, shape index: {}]   ;;  %s168_s1 = inlined_call_operand.vmem [shape: f32[2,8,256], index: 1, kind: input, shape index: {}]   ;;  %s169_s2 = inlined_call_operand.hbm [shape: f32[2,8,256], index: 2, kind: output, shape index: {}]  }
   0x1   :  { %v14_v0 = vld [vmem:[%s167_s0 + $0x10] sm:$0xff]  ;;  %v12_v1 = vld [vmem:[%s167_s0] sm:$0xff]  ;;  %87 = vset.pattern.permute.xlu1 %v112_v2  ;;  %86 = vset.pattern.permute.xlu0 %v112_v2 }
   0x2   :  { %43 = vperm.xlu1 %87, %v14_v0   ;;  %20 = vperm.xlu0 %86, %v12_v1  }
   0x3   :  { %7 = vsyncpa [#allocation3], 0  ;;  %v15_v3 = vld [vmem:[%s167_s0 + $0x18] sm:$0xff]  ;;  %v13_v4 = vld [vmem:[%s167_s0 + $0x8] sm:$0xff]  ;;  %s113_s0 = smov [#allocation2]  }
   0x4   :  { %v39_v7 = vld [vmem:[%s168_s1] sm:$0xff]  ;;  %v40_v8 = vld [vmem:[%s168_s1 + $0x8] sm:$0xff]  ;;  %v80_v9 = vld [vmem:[%s168_s1 + $0x10] sm:$0xff]  ;;  %s67_s25 = sshll.u32 %s113_s0, 4  ;;  %s68_s25 = int_to_ptr.vmem [resolvable:$true] %s67_s25 }
   0x5   :  { %v81_v10 = vld [vmem:[%s168_s1 + $0x18] sm:$0xff]  ;;  %s88_s1 = scalar_lea.vmem %s68_s25, 512  ;;  %p93_p1 = scmp.lt.s32.totalorder %s68_s25, %s68_s25 }
   0x6   :  { %52 = vperm.xlu1 %87, %v15_v3   ;;  %30 = vperm.xlu0 %86, %v13_v4   ;;  %p89_p0 = scmp.ne.s32.totalorder %s68_s25, %s88_s1  ;;  %p94_p2 = scmp.lt.s32.totalorder %s88_s1, %s88_s1 }
   0x8   :  { %p95_p3 = por %p94_p2, %p93_p1 }
   0xa   :  { %p96_p4 = pnand %p95_p3, %p89_p0 }
  0x81   :  { %v44_v5 = vpop.permute.xlu1 %43  ;;  %v21_v6 = vpop.permute.xlu0 %20 }
  0x82   :  { %v46_v11 = vmul.f32 %v44_v5, %v39_v7  ;;  %v47_v12 = vmul.f32 %v44_v5, %v40_v8  ;;  %v23_v13 = vmul.f32 %v39_v7, %v21_v6  ;;  %v24_v14 = vmul.f32 %v40_v8, %v21_v6 }
  0x85   :  { %v53_v15 = vpop.permute.xlu1 %52  ;;  %v31_v16 = vpop.permute.xlu0 %30 }
  0x86   :  { %v55_v17 = vmul.f32 %v80_v9, %v53_v15  ;;  %v56_v18 = vmul.f32 %v81_v10, %v53_v15  ;;  %v33_v19 = vmul.f32 %v80_v9, %v31_v16  ;;  %v34_v20 = vmul.f32 %v81_v10, %v31_v16 }
  0x88   :  { %v57_v21 = vadd.f32 %v55_v17, %v46_v11  ;;  %v58_v22 = vadd.f32 %v56_v18, %v47_v12  ;;  %v35_v23 = vadd.f32 %v33_v19, %v23_v13  ;;  %v36_v24 = vadd.f32 %v34_v20, %v24_v14 }
  0x8a   :  { %60 = vst [vmem:[#allocation2 + $0x10] sm:$0xff] %v57_v21  ;;  %61 = vst [vmem:[#allocation2 + $0x18] sm:$0xff] %v58_v22 }
  0x8b   :  { %37 = vst [vmem:[#allocation2] sm:$0xff] %v35_v23  ;;  %38 = vst [vmem:[#allocation2 + $0x8] sm:$0xff] %v36_v24 }
  0x8c   :  { %99 = shalt.err (!%p96_p4)
}
  0x8d   :  { %s100_s28 = scalar_lea.hbm %s169_s2, 512 }
  0x8e   :  { %p101_p5 = scmp.ne.s32.totalorder %s169_s2, %s100_s28  ;;  %p104_p6 = scmp.lt.u32.totalorder %s100_s28, %s169_s2 }
  0x90   :  { %p106_p7 = pnand %p104_p6, %p101_p5 }
  0x92   :  { %109 = shalt.err (!%p106_p7)
}
  0x93   :  { %s114_s5 = smov 256   ;;  %s115_s6 = smov 16  }
  0x94   :  { %73 = dma.vmem_to_hbm [thread:$0]  %s68_s25, 512, %s169_s2, [#allocation3], %s114_s5, %s114_s5, %s115_s6  }
  0x95   :  { %110 = dma.done.wait [#allocation3], 512  }
  0x96   :  { %111 = vsyncadd [#allocation3], 4294966784 }
  0x97   :  { %77 = vsyncpa [#allocation3], 1 }

</bundles_post_ra>
